<compile_context>
chip_gen: v7x
topology: tpu7x:2x2x1
jax: 0.10.0
libtpu: 0.0.40
codegen_flags: <defaults>
</compile_context>

<pallas_src>
import math
import functools

import jax
import jax.numpy as jnp
from jax import lax
from jax.experimental import pallas as pl
from jax.experimental.pallas import tpu as pltpu


def _mha_kernel(x_q_ref, x_kv_ref, mask_ref,
                wq_ref, bq_ref, wkv_ref, bkv_ref, wo_ref, bo_ref,
                out_ref,
                kv_ref, att_ref,
                *, n_heads, dim_per_head, dim):
    """One grid step = (batch element, query tile)."""
    qi = pl.program_id(1)

    # Fused K/V projection, computed once per batch element (query tile 0) and
    # kept in VMEM scratch for all query tiles of that batch element.
    @pl.when(qi == 0)
    def _():
        x_kv = x_kv_ref[0]                                            # (Lk, D)
        kv_ref[...] = (jnp.dot(x_kv, wkv_ref[...],
                               preferred_element_type=jnp.float32)
                       + bkv_ref[...])

    # Q projection; the 1/sqrt(dim_per_head) scale is pre-folded into wq/bq.
    q = (jnp.dot(x_q_ref[0], wq_ref[...],
                 preferred_element_type=jnp.float32) + bq_ref[...])   # (TQ, D)

    kv = kv_ref[...]                                                  # (Lk, 2D)
    masked = mask_ref[0] == 0                                         # (1, Lk)
    neg = jnp.float32(-1e20)                                          # ParlAI neginf(f32)

    # Per-head attention (static unroll).  For real model sizes dim_per_head is
    # lane-friendly (>= 64, ideally 128); in the toy config these are sub-lane
    # slices which Mosaic lowers with masked accesses.
    for h in range(n_heads):
        lo = h * dim_per_head
        qh = q[:, lo:lo + dim_per_head]                               # (TQ, Dh)
        kh = kv[:, lo:lo + dim_per_head]                              # (Lk, Dh)
        vh = kv[:, dim + lo:dim + lo + dim_per_head]                  # (Lk, Dh)

        # Contract on the trailing dim of both operands: no kh.T transpose.
        s = lax.dot_general(qh, kh, (((1,), (1,)), ((), ())),
                            preferred_element_type=jnp.float32)       # (TQ, Lk)
        s = jnp.where(masked, neg, s)
        s = s - jnp.max(s, axis=-1, keepdims=True)                    # stable softmax
        e = jnp.exp(s)
        denom = jnp.sum(e, axis=-1, keepdims=True)                    # (TQ, 1)
        o = jnp.dot(e, vh, preferred_element_type=jnp.float32)        # (TQ, Dh)
        # Normalization deferred past P@V: one narrow (TQ,1) reciprocal +
        # broadcast multiply instead of dividing the whole (TQ, Lk) tile.
        att_ref[:, lo:lo + dim_per_head] = o * pl.reciprocal(denom, approx=False)

    out = (jnp.dot(att_ref[...], wo_ref[...],
                   preferred_element_type=jnp.float32) + bo_ref[...])
    out_ref[0] = out.astype(out_ref.dtype)


def multi_head_attention(query, mask, params, n_heads, *, q_tile=128):
    """Self-attention (key = value = query), matching the PyTorch forward."""
    B, L, D = query.shape
    assert D % n_heads == 0
    dph = D // n_heads
    scale = math.sqrt(dph)

    # Host-side parameter packing (would normally be done once at init time):
    #   * fold the 1/sqrt(dim_per_head) scale into the Q projection,
    #   * fuse the K and V projections into one (D, 2D) matmul.
    wq = params["wq"] / scale
    bq = params["bq"] / scale
    wkv = jnp.concatenate([params["wk"], params["wv"]], axis=1)       # (D, 2D)
    bkv = jnp.concatenate([params["bk"], params["bv"]], axis=1)       # (1, 2D)
    wo, bo = params["wo"], params["bo"]

    mask3 = mask.reshape(B, 1, -1).astype(jnp.float32)                # (B, 1, Lk)
    Lk = mask3.shape[-1]

    tq = min(q_tile, L)
    if L % tq:
        tq = L                       # keep blocks exact (no boundary padding)
    n_q = L // tq

    kernel = functools.partial(_mha_kernel, n_heads=n_heads,
                               dim_per_head=dph, dim=D)

    def inv(shape):                  # grid-invariant block: no re-DMA per step
        return pl.BlockSpec(shape, lambda b, qi: (0, 0))

    return pl.pallas_call(
        kernel,
        out_shape=jax.ShapeDtypeStruct((B, L, D), query.dtype),
        grid_spec=pltpu.PrefetchScalarGridSpec(
            num_scalar_prefetch=0,
            grid=(B, n_q),
            in_specs=[
                pl.BlockSpec((1, tq, D), lambda b, qi: (b, qi, 0)),   # query tile
                pl.BlockSpec((1, Lk, D), lambda b, qi: (b, 0, 0)),    # full seq for K/V
                pl.BlockSpec((1, 1, Lk), lambda b, qi: (b, 0, 0)),    # mask
                inv((D, D)), inv((1, D)),          # q_lin (scale folded in)
                inv((D, 2 * D)), inv((1, 2 * D)),  # fused k_lin + v_lin
                inv((D, D)), inv((1, D)),          # out_lin
            ],
            out_specs=pl.BlockSpec((1, tq, D), lambda b, qi: (b, qi, 0)),
            scratch_shapes=[
                pltpu.VMEM((Lk, 2 * D), jnp.float32),   # K/V projections (per batch elem)
                pltpu.VMEM((tq, D), jnp.float32),       # per-tile concat-free head outputs
            ],
        ),
        compiler_params=pltpu.CompilerParams(
            dimension_semantics=("parallel", "arbitrary"),
            vmem_limit_bytes=48 * 1024 * 1024,   # explicit; headroom under v7x's 64 MiB
        ),
    )(query, query, mask3, wq, bq, wkv, bkv, wo, bo)


def _reference(query, mask, params, n_heads):
    """Pure-JAX reference matching the PyTorch semantics."""
    B, L, D = query.shape
    dph = D // n_heads
    scale = math.sqrt(dph)
    q = query @ params["wq"] + params["bq"]
    k = query @ params["wk"] + params["bk"]
    v = query @ params["wv"] + params["bv"]

    def split(t):
        return t.reshape(B, L, n_heads, dph).transpose(0, 2, 1, 3)

    qh, kh, vh = split(q) / scale, split(k), split(v)
    s = jnp.einsum("bhqd,bhkd->bhqk", qh, kh)
    attn_mask = (mask.reshape(B, 1, 1, -1) == 0)
    s = jnp.where(attn_mask, jnp.float32(-1e20), s)
    w = jax.nn.softmax(s, axis=-1)
    att = jnp.einsum("bhqk,bhkd->bhqd", w, vh)
    att = att.transpose(0, 2, 1, 3).reshape(B, L, D)
    return att @ params["wo"] + params["bo"]


def _init_params(key, dim):
    """Deterministic synthetic init: xavier_normal_ weights, uniform biases."""
    keys = jax.random.split(key, 8)
    xavier_std = math.sqrt(2.0 / (dim + dim))
    bias_bound = 1.0 / math.sqrt(dim)

    def w(k):   # stored as (in_dim, out_dim), i.e. already transposed vs nn.Linear
        return jax.random.normal(k, (dim, dim), jnp.float32) * xavier_std

    def b(k):
        return jax.random.uniform(k, (1, dim), jnp.float32,
                                  minval=-bias_bound, maxval=bias_bound)

    return {
        "wq": w(keys[0]), "bq": b(keys[1]),
        "wk": w(keys[2]), "bk": b(keys[3]),
        "wv": w(keys[4]), "bv": b(keys[5]),
        "wo": w(keys[6]), "bo": b(keys[7]),
    }


if __name__ == "__main__":
    n_heads = 4
    dim = 32
    batch = 2
    seq = 8

    root = jax.random.PRNGKey(0)
    k_params, k_query = jax.random.split(root)

    params = _init_params(k_params, dim)
    query = jax.random.normal(k_query, (batch, seq, dim), jnp.float32)

    # mask: (batch, key_len); 1 = keep, 0 = padded position.
    lengths = jnp.array([seq, seq - 3], dtype=jnp.int32)
    mask = (jnp.arange(seq)[None, :] < lengths[:, None]).astype(jnp.float32)

    out = multi_head_attention(query, mask, params, n_heads)
    out = jax.block_until_ready(out)

    ref = _reference(query, mask, params, n_heads)
    assert out.shape == (batch, seq, dim)
    assert jnp.allclose(out, ref, rtol=1e-4, atol=1e-4), "mismatch vs reference"

    print("KERNEL_OK")
</pallas_src>

<mosaic_0001>
module attributes {stable_mosaic.version = 11 : i64} {
  func.func @_mha_kernel(%arg0: i32, %arg1: i32, %arg2: memref<1x8x32xf32, #tpu.memory_space<vmem>>, %arg3: memref<1x8x32xf32, #tpu.memory_space<vmem>>, %arg4: memref<1x1x8xf32, #tpu.memory_space<vmem>>, %arg5: memref<32x32xf32, #tpu.memory_space<vmem>>, %arg6: memref<1x32xf32, #tpu.memory_space<vmem>>, %arg7: memref<32x64xf32, #tpu.memory_space<vmem>>, %arg8: memref<1x64xf32, #tpu.memory_space<vmem>>, %arg9: memref<32x32xf32, #tpu.memory_space<vmem>>, %arg10: memref<1x32xf32, #tpu.memory_space<vmem>>, %arg11: memref<1x8x32xf32, #tpu.memory_space<vmem>>, %arg12: memref<8x64xf32, #tpu.memory_space<vmem>>, %arg13: memref<8x32xf32, #tpu.memory_space<vmem>>) attributes {dimension_semantics = [#tpu.dimension_semantics<parallel>, #tpu.dimension_semantics<arbitrary>], iteration_bounds = array<i64: 2, 1>, scalar_prefetch = 0 : i64, scratch_operands = 2 : i64, tpu.core_type = #tpu.core_type<tc>, window_params = [{transform_indices = @transform_0, window_bounds = array<i64: 1, 8, 32>}, {transform_indices = @transform_1, window_bounds = array<i64: 1, 8, 32>}, {transform_indices = @transform_2, window_bounds = array<i64: 1, 1, 8>}, {pipeline_mode = #tpu.pipeline_mode<synchronous>, transform_indices = @transform_3, window_bounds = array<i64: 32, 32>}, {pipeline_mode = #tpu.pipeline_mode<synchronous>, transform_indices = @transform_4, window_bounds = array<i64: 1, 32>}, {pipeline_mode = #tpu.pipeline_mode<synchronous>, transform_indices = @transform_5, window_bounds = array<i64: 32, 64>}, {pipeline_mode = #tpu.pipeline_mode<synchronous>, transform_indices = @transform_6, window_bounds = array<i64: 1, 64>}, {pipeline_mode = #tpu.pipeline_mode<synchronous>, transform_indices = @transform_7, window_bounds = array<i64: 32, 32>}, {pipeline_mode = #tpu.pipeline_mode<synchronous>, transform_indices = @transform_8, window_bounds = array<i64: 1, 32>}, {transform_indices = @transform_9, window_bounds = array<i64: 1, 8, 32>}]} {
    %c0_i32 = arith.constant 0 : i32
    %0 = arith.cmpi eq, %arg1, %c0_i32 : i32
    %1 = arith.extui %0 : i1 to i32
    %c0_i32_0 = arith.constant 0 : i32
    %2 = arith.cmpi ne, %1, %c0_i32_0 : i32
    scf.if %2 {
      %c0_48 = arith.constant 0 : index
      %c0_49 = arith.constant 0 : index
      %c0_50 = arith.constant 0 : index
      %104 = vector.load %arg3[%c0_48, %c0_49, %c0_50] : memref<1x8x32xf32, #tpu.memory_space<vmem>>, vector<1x8x32xf32>
      %105 = vector.shape_cast %104 : vector<1x8x32xf32> to vector<8x32xf32>
      %c0_51 = arith.constant 0 : index
      %c0_52 = arith.constant 0 : index
      %106 = vector.load %arg7[%c0_51, %c0_52] : memref<32x64xf32, #tpu.memory_space<vmem>>, vector<32x64xf32>
      %cst_53 = arith.constant dense<0.000000e+00> : vector<8x64xf32>
      %107 = tpu.matmul %105, %106, %cst_53 {dimension_numbers = #tpu.dot_dimension_numbers<[1], [0], [0], [1], [0, 0, 1, 1], [], []>} : vector<8x32xf32>, vector<32x64xf32>, vector<8x64xf32> -> vector<8x64xf32>
      %c0_54 = arith.constant 0 : index
      %c0_55 = arith.constant 0 : index
      %108 = vector.load %arg8[%c0_54, %c0_55] : memref<1x64xf32, #tpu.memory_space<vmem>>, vector<1x64xf32>
      %109 = vector.broadcast %108 : vector<1x64xf32> to vector<8x64xf32>
      %110 = arith.addf %107, %109 : vector<8x64xf32>
      %c0_56 = arith.constant 0 : index
      %c0_57 = arith.constant 0 : index
      %111 = vector.load %arg12[%c0_56, %c0_57] : memref<8x64xf32, #tpu.memory_space<vmem>>, vector<8x64xf32>
      tpu.vector_store %arg12[%c0_56, %c0_57], %110 {strides = array<i32>} : memref<8x64xf32, #tpu.memory_space<vmem>>, vector<8x64xf32>,
    } else {
    }
    %c0 = arith.constant 0 : index
    %c0_1 = arith.constant 0 : index
    %c0_2 = arith.constant 0 : index
    %3 = vector.load %arg2[%c0, %c0_1, %c0_2] : memref<1x8x32xf32, #tpu.memory_space<vmem>>, vector<1x8x32xf32>
    %4 = vector.shape_cast %3 : vector<1x8x32xf32> to vector<8x32xf32>
    %c0_3 = arith.constant 0 : index
    %c0_4 = arith.constant 0 : index
    %5 = vector.load %arg5[%c0_3, %c0_4] : memref<32x32xf32, #tpu.memory_space<vmem>>, vector<32x32xf32>
    %cst = arith.constant dense<0.000000e+00> : vector<8x32xf32>
    %6 = tpu.matmul %4, %5, %cst {dimension_numbers = #tpu.dot_dimension_numbers<[1], [0], [0], [1], [0, 0, 1, 1], [], []>} : vector<8x32xf32>, vector<32x32xf32>, vector<8x32xf32> -> vector<8x32xf32>
    %c0_5 = arith.constant 0 : index
    %c0_6 = arith.constant 0 : index
    %7 = vector.load %arg6[%c0_5, %c0_6] : memref<1x32xf32, #tpu.memory_space<vmem>>, vector<1x32xf32>
    %8 = vector.broadcast %7 : vector<1x32xf32> to vector<8x32xf32>
    %9 = arith.addf %6, %8 : vector<8x32xf32>
    %c0_7 = arith.constant 0 : index
    %c0_8 = arith.constant 0 : index
    %10 = vector.load %arg12[%c0_7, %c0_8] : memref<8x64xf32, #tpu.memory_space<vmem>>, vector<8x64xf32>
    %c0_9 = arith.constant 0 : index
    %c0_10 = arith.constant 0 : index
    %c0_11 = arith.constant 0 : index
    %11 = vector.load %arg4[%c0_9, %c0_10, %c0_11] : memref<1x1x8xf32, #tpu.memory_space<vmem>>, vector<1x1x8xf32>
    %12 = vector.shape_cast %11 : vector<1x1x8xf32> to vector<1x8xf32>
    %cst_12 = arith.constant 0.000000e+00 : f32
    %13 = vector.broadcast %cst_12 : f32 to vector<1x8xf32>
    %14 = arith.cmpf oeq, %12, %13 : vector<1x8xf32>
    %15 = vector.extract_strided_slice %9 {offsets = [0, 0], sizes = [8, 8], strides = [1, 1]} : vector<8x32xf32> to vector<8x8xf32>
    %16 = vector.extract_strided_slice %10 {offsets = [0, 0], sizes = [8, 8], strides = [1, 1]} : vector<8x64xf32> to vector<8x8xf32>
    %17 = vector.extract_strided_slice %10 {offsets = [0, 32], sizes = [8, 8], strides = [1, 1]} : vector<8x64xf32> to vector<8x8xf32>
    %cst_13 = arith.constant dense<0.000000e+00> : vector<8x8xf32>
    %18 = tpu.matmul %15, %16, %cst_13 {dimension_numbers = #tpu.dot_dimension_numbers<[1], [1], [0], [0], [0, 0, 1, 0], [], []>} : vector<8x8xf32>, vector<8x8xf32>, vector<8x8xf32> -> vector<8x8xf32>
    %cst_14 = arith.constant -1.000000e+20 : f32
    %19 = vector.shape_cast %14 : vector<1x8xi1> to vector<1x8xi1>
    %20 = vector.broadcast %19 : vector<1x8xi1> to vector<8x8xi1>
    %21 = vector.broadcast %cst_14 : f32 to vector<8x8xf32>
    %22 = arith.select %20, %21, %18 : vector<8x8xi1>, vector<8x8xf32>
    %cst_15 = arith.constant dense<0xFF800000> : vector<8xf32>
    %23 = vector.multi_reduction <maximumf>, %22, %cst_15 [1] : vector<8x8xf32> to vector<8xf32>
    %24 = vector.shape_cast %23 : vector<8xf32> to vector<8x1xf32>
    %25 = vector.broadcast %24 : vector<8x1xf32> to vector<8x8xf32>
    %26 = arith.subf %22, %25 : vector<8x8xf32>
    %27 = math.exp %26 : vector<8x8xf32>
    %cst_16 = arith.constant dense<0.000000e+00> : vector<8xf32>
    %28 = vector.multi_reduction <add>, %27, %cst_16 [1] : vector<8x8xf32> to vector<8xf32>
    %29 = vector.shape_cast %28 : vector<8xf32> to vector<8x1xf32>
    %cst_17 = arith.constant dense<0.000000e+00> : vector<8x8xf32>
    %30 = tpu.matmul %27, %17, %cst_17 {dimension_numbers = #tpu.dot_dimension_numbers<[1], [0], [0], [1], [0, 0, 1, 1], [], []>} : vector<8x8xf32>, vector<8x8xf32>, vector<8x8xf32> -> vector<8x8xf32>
    %31 = tpu.reciprocal %29 : vector<8x1xf32> -> vector<8x1xf32>
    %32 = vector.broadcast %31 : vector<8x1xf32> to vector<8x8xf32>
    %33 = arith.mulf %30, %32 : vector<8x8xf32>
    %c0_18 = arith.constant 0 : index
    %c0_19 = arith.constant 0 : index
    %34 = vector.load %arg13[%c0_18, %c0_19] : memref<8x32xf32, #tpu.memory_space<vmem>>, vector<8x8xf32>
    tpu.vector_store %arg13[%c0_18, %c0_19], %33 {strides = array<i32>} : memref<8x32xf32, #tpu.memory_space<vmem>>, vector<8x8xf32>,
    %35 = vector.extract_strided_slice %9 {offsets = [0, 8], sizes = [8, 8], strides = [1, 1]} : vector<8x32xf32> to vector<8x8xf32>
    %36 = vector.extract_strided_slice %10 {offsets = [0, 8], sizes = [8, 8], strides = [1, 1]} : vector<8x64xf32> to vector<8x8xf32>
    %37 = vector.extract_strided_slice %10 {offsets = [0, 40], sizes = [8, 8], strides = [1, 1]} : vector<8x64xf32> to vector<8x8xf32>
    %cst_20 = arith.constant dense<0.000000e+00> : vector<8x8xf32>
    %38 = tpu.matmul %35, %36, %cst_20 {dimension_numbers = #tpu.dot_dimension_numbers<[1], [1], [0], [0], [0, 0, 1, 0], [], []>} : vector<8x8xf32>, vector<8x8xf32>, vector<8x8xf32> -> vector<8x8xf32>
    %cst_21 = arith.constant -1.000000e+20 : f32
    %39 = vector.shape_cast %14 : vector<1x8xi1> to vector<1x8xi1>
    %40 = vector.broadcast %39 : vector<1x8xi1> to vector<8x8xi1>
    %41 = vector.broadcast %cst_21 : f32 to vector<8x8xf32>
    %42 = arith.select %40, %41, %38 : vector<8x8xi1>, vector<8x8xf32>
    %cst_22 = arith.constant dense<0xFF800000> : vector<8xf32>
    %43 = vector.multi_reduction <maximumf>, %42, %cst_22 [1] : vector<8x8xf32> to vector<8xf32>
    %44 = vector.shape_cast %43 : vector<8xf32> to vector<8x1xf32>
    %45 = vector.broadcast %44 : vector<8x1xf32> to vector<8x8xf32>
    %46 = arith.subf %42, %45 : vector<8x8xf32>
    %47 = math.exp %46 : vector<8x8xf32>
    %cst_23 = arith.constant dense<0.000000e+00> : vector<8xf32>
    %48 = vector.multi_reduction <add>, %47, %cst_23 [1] : vector<8x8xf32> to vector<8xf32>
    %49 = vector.shape_cast %48 : vector<8xf32> to vector<8x1xf32>
    %cst_24 = arith.constant dense<0.000000e+00> : vector<8x8xf32>
    %50 = tpu.matmul %47, %37, %cst_24 {dimension_numbers = #tpu.dot_dimension_numbers<[1], [0], [0], [1], [0, 0, 1, 1], [], []>} : vector<8x8xf32>, vector<8x8xf32>, vector<8x8xf32> -> vector<8x8xf32>
    %51 = tpu.reciprocal %49 : vector<8x1xf32> -> vector<8x1xf32>
    %52 = vector.broadcast %51 : vector<8x1xf32> to vector<8x8xf32>
    %53 = arith.mulf %50, %52 : vector<8x8xf32>
    %c0_25 = arith.constant 0 : index
    %c8 = arith.constant 8 : index
    %54 = vector.load %arg13[%c0_25, %c8] : memref<8x32xf32, #tpu.memory_space<vmem>>, vector<8x8xf32>
    tpu.vector_store %arg13[%c0_25, %c8], %53 {strides = array<i32>} : memref<8x32xf32, #tpu.memory_space<vmem>>, vector<8x8xf32>,
    %55 = vector.extract_strided_slice %9 {offsets = [0, 16], sizes = [8, 8], strides = [1, 1]} : vector<8x32xf32> to vector<8x8xf32>
    %56 = vector.extract_strided_slice %10 {offsets = [0, 16], sizes = [8, 8], strides = [1, 1]} : vector<8x64xf32> to vector<8x8xf32>
    %57 = vector.extract_strided_slice %10 {offsets = [0, 48], sizes = [8, 8], strides = [1, 1]} : vector<8x64xf32> to vector<8x8xf32>
    %cst_26 = arith.constant dense<0.000000e+00> : vector<8x8xf32>
    %58 = tpu.matmul %55, %56, %cst_26 {dimension_numbers = #tpu.dot_dimension_numbers<[1], [1], [0], [0], [0, 0, 1, 0], [], []>} : vector<8x8xf32>, vector<8x8xf32>, vector<8x8xf32> -> vector<8x8xf32>
    %cst_27 = arith.constant -1.000000e+20 : f32
    %59 = vector.shape_cast %14 : vector<1x8xi1> to vector<1x8xi1>
    %60 = vector.broadcast %59 : vector<1x8xi1> to vector<8x8xi1>
    %61 = vector.broadcast %cst_27 : f32 to vector<8x8xf32>
    %62 = arith.select %60, %61, %58 : vector<8x8xi1>, vector<8x8xf32>
    %cst_28 = arith.constant dense<0xFF800000> : vector<8xf32>
    %63 = vector.multi_reduction <maximumf>, %62, %cst_28 [1] : vector<8x8xf32> to vector<8xf32>
    %64 = vector.shape_cast %63 : vector<8xf32> to vector<8x1xf32>
    %65 = vector.broadcast %64 : vector<8x1xf32> to vector<8x8xf32>
    %66 = arith.subf %62, %65 : vector<8x8xf32>
    %67 = math.exp %66 : vector<8x8xf32>
    %cst_29 = arith.constant dense<0.000000e+00> : vector<8xf32>
    %68 = vector.multi_reduction <add>, %67, %cst_29 [1] : vector<8x8xf32> to vector<8xf32>
    %69 = vector.shape_cast %68 : vector<8xf32> to vector<8x1xf32>
    %cst_30 = arith.constant dense<0.000000e+00> : vector<8x8xf32>
    %70 = tpu.matmul %67, %57, %cst_30 {dimension_numbers = #tpu.dot_dimension_numbers<[1], [0], [0], [1], [0, 0, 1, 1], [], []>} : vector<8x8xf32>, vector<8x8xf32>, vector<8x8xf32> -> vector<8x8xf32>
    %71 = tpu.reciprocal %69 : vector<8x1xf32> -> vector<8x1xf32>
    %72 = vector.broadcast %71 : vector<8x1xf32> to vector<8x8xf32>
    %73 = arith.mulf %70, %72 : vector<8x8xf32>
    %c0_31 = arith.constant 0 : index
    %c16 = arith.constant 16 : index
    %74 = vector.load %arg13[%c0_31, %c16] : memref<8x32xf32, #tpu.memory_space<vmem>>, vector<8x8xf32>
    tpu.vector_store %arg13[%c0_31, %c16], %73 {strides = array<i32>} : memref<8x32xf32, #tpu.memory_space<vmem>>, vector<8x8xf32>,
    %75 = vector.extract_strided_slice %9 {offsets = [0, 24], sizes = [8, 8], strides = [1, 1]} : vector<8x32xf32> to vector<8x8xf32>
    %76 = vector.extract_strided_slice %10 {offsets = [0, 24], sizes = [8, 8], strides = [1, 1]} : vector<8x64xf32> to vector<8x8xf32>
    %77 = vector.extract_strided_slice %10 {offsets = [0, 56], sizes = [8, 8], strides = [1, 1]} : vector<8x64xf32> to vector<8x8xf32>
    %cst_32 = arith.constant dense<0.000000e+00> : vector<8x8xf32>
    %78 = tpu.matmul %75, %76, %cst_32 {dimension_numbers = #tpu.dot_dimension_numbers<[1], [1], [0], [0], [0, 0, 1, 0], [], []>} : vector<8x8xf32>, vector<8x8xf32>, vector<8x8xf32> -> vector<8x8xf32>
    %cst_33 = arith.constant -1.000000e+20 : f32
    %79 = vector.shape_cast %14 : vector<1x8xi1> to vector<1x8xi1>
    %80 = vector.broadcast %79 : vector<1x8xi1> to vector<8x8xi1>
    %81 = vector.broadcast %cst_33 : f32 to vector<8x8xf32>
    %82 = arith.select %80, %81, %78 : vector<8x8xi1>, vector<8x8xf32>
    %cst_34 = arith.constant dense<0xFF800000> : vector<8xf32>
    %83 = vector.multi_reduction <maximumf>, %82, %cst_34 [1] : vector<8x8xf32> to vector<8xf32>
    %84 = vector.shape_cast %83 : vector<8xf32> to vector<8x1xf32>
    %85 = vector.broadcast %84 : vector<8x1xf32> to vector<8x8xf32>
    %86 = arith.subf %82, %85 : vector<8x8xf32>
    %87 = math.exp %86 : vector<8x8xf32>
    %cst_35 = arith.constant dense<0.000000e+00> : vector<8xf32>
    %88 = vector.multi_reduction <add>, %87, %cst_35 [1] : vector<8x8xf32> to vector<8xf32>
    %89 = vector.shape_cast %88 : vector<8xf32> to vector<8x1xf32>
    %cst_36 = arith.constant dense<0.000000e+00> : vector<8x8xf32>
    %90 = tpu.matmul %87, %77, %cst_36 {dimension_numbers = #tpu.dot_dimension_numbers<[1], [0], [0], [1], [0, 0, 1, 1], [], []>} : vector<8x8xf32>, vector<8x8xf32>, vector<8x8xf32> -> vector<8x8xf32>
    %91 = tpu.reciprocal %89 : vector<8x1xf32> -> vector<8x1xf32>
    %92 = vector.broadcast %91 : vector<8x1xf32> to vector<8x8xf32>
    %93 = arith.mulf %90, %92 : vector<8x8xf32>
    %c0_37 = arith.constant 0 : index
    %c24 = arith.constant 24 : index
    %94 = vector.load %arg13[%c0_37, %c24] : memref<8x32xf32, #tpu.memory_space<vmem>>, vector<8x8xf32>
    tpu.vector_store %arg13[%c0_37, %c24], %93 {strides = array<i32>} : memref<8x32xf32, #tpu.memory_space<vmem>>, vector<8x8xf32>,
    %c0_38 = arith.constant 0 : index
    %c0_39 = arith.constant 0 : index
    %95 = vector.load %arg13[%c0_38, %c0_39] : memref<8x32xf32, #tpu.memory_space<vmem>>, vector<8x32xf32>
    %c0_40 = arith.constant 0 : index
    %c0_41 = arith.constant 0 : index
    %96 = vector.load %arg9[%c0_40, %c0_41] : memref<32x32xf32, #tpu.memory_space<vmem>>, vector<32x32xf32>
    %cst_42 = arith.constant dense<0.000000e+00> : vector<8x32xf32>
    %97 = tpu.matmul %95, %96, %cst_42 {dimension_numbers = #tpu.dot_dimension_numbers<[1], [0], [0], [1], [0, 0, 1, 1], [], []>} : vector<8x32xf32>, vector<32x32xf32>, vector<8x32xf32> -> vector<8x32xf32>
    %c0_43 = arith.constant 0 : index
    %c0_44 = arith.constant 0 : index
    %98 = vector.load %arg10[%c0_43, %c0_44] : memref<1x32xf32, #tpu.memory_space<vmem>>, vector<1x32xf32>
    %99 = vector.broadcast %98 : vector<1x32xf32> to vector<8x32xf32>
    %100 = arith.addf %97, %99 : vector<8x32xf32>
    %c0_45 = arith.constant 0 : index
    %c0_46 = arith.constant 0 : index
    %c0_47 = arith.constant 0 : index
    %101 = vector.load %arg11[%c0_45, %c0_46, %c0_47] : memref<1x8x32xf32, #tpu.memory_space<vmem>>, vector<1x8x32xf32>
    %102 = vector.shape_cast %101 : vector<1x8x32xf32> to vector<8x32xf32>
    %103 = vector.shape_cast %100 : vector<8x32xf32> to vector<1x8x32xf32>
    tpu.vector_store %arg11[%c0_45, %c0_46, %c0_47], %103 {strides = array<i32>} : memref<1x8x32xf32, #tpu.memory_space<vmem>>, vector<1x8x32xf32>,
    return
  }
  func.func @transform_0(%arg0: i32, %arg1: i32) -> (i32, i32, i32) {
    %c0_i32 = arith.constant 0 : i32
    %c0_i32_0 = arith.constant 0 : i32
    return %arg0, %arg1, %c0_i32 : i32, i32, i32
  }
  func.func @transform_1(%arg0: i32, %arg1: i32) -> (i32, i32, i32) {
    %c0_i32 = arith.constant 0 : i32
    %c0_i32_0 = arith.constant 0 : i32
    %c0_i32_1 = arith.constant 0 : i32
    return %arg0, %c0_i32, %c0_i32_0 : i32, i32, i32
  }
  func.func @transform_2(%arg0: i32, %arg1: i32) -> (i32, i32, i32) {
    %c0_i32 = arith.constant 0 : i32
    %c0_i32_0 = arith.constant 0 : i32
    %c0_i32_1 = arith.constant 0 : i32
    return %arg0, %c0_i32, %c0_i32_0 : i32, i32, i32
  }
  func.func @transform_3(%arg0: i32, %arg1: i32) -> (i32, i32) {
    %c0_i32 = arith.constant 0 : i32
    %c0_i32_0 = arith.constant 0 : i32
    %c0_i32_1 = arith.constant 0 : i32
    return %c0_i32, %c0_i32_0 : i32, i32
  }
  func.func @transform_4(%arg0: i32, %arg1: i32) -> (i32, i32) {
    %c0_i32 = arith.constant 0 : i32
    %c0_i32_0 = arith.constant 0 : i32
    %c0_i32_1 = arith.constant 0 : i32
    return %c0_i32, %c0_i32_0 : i32, i32
  }
  func.func @transform_5(%arg0: i32, %arg1: i32) -> (i32, i32) {
    %c0_i32 = arith.constant 0 : i32
    %c0_i32_0 = arith.constant 0 : i32
    %c0_i32_1 = arith.constant 0 : i32
    return %c0_i32, %c0_i32_0 : i32, i32
  }
  func.func @transform_6(%arg0: i32, %arg1: i32) -> (i32, i32) {
    %c0_i32 = arith.constant 0 : i32
    %c0_i32_0 = arith.constant 0 : i32
    %c0_i32_1 = arith.constant 0 : i32
    return %c0_i32, %c0_i32_0 : i32, i32
  }
  func.func @transform_7(%arg0: i32, %arg1: i32) -> (i32, i32) {
    %c0_i32 = arith.constant 0 : i32
    %c0_i32_0 = arith.constant 0 : i32
    %c0_i32_1 = arith.constant 0 : i32
    return %c0_i32, %c0_i32_0 : i32, i32
  }
  func.func @transform_8(%arg0: i32, %arg1: i32) -> (i32, i32) {
    %c0_i32 = arith.constant 0 : i32
    %c0_i32_0 = arith.constant 0 : i32
    %c0_i32_1 = arith.constant 0 : i32
    return %c0_i32, %c0_i32_0 : i32, i32
  }
  func.func @transform_9(%arg0: i32, %arg1: i32) -> (i32, i32, i32) {
    %c0_i32 = arith.constant 0 : i32
    %c0_i32_0 = arith.constant 0 : i32
    return %arg0, %arg1, %c0_i32 : i32, i32, i32
  }
}

</mosaic_0001>

<bundles_post_ra>
// kernel: tpu_custom_call.1
= control target key start
LH: loop header
LB: loop body
LE: loop exit
PB: predicated region body
PF: predicated region fallthrough
CT: control target
= control target key end

     0   :  { %s2587_s0 = inlined_call_operand.hbm [shape: f32[2,8,32], index: 0, kind: input, shape index: {}]   ;;  %s2588_s1 = inlined_call_operand.hbm [shape: f32[2,8,32], index: 1, kind: input, shape index: {}]   ;;  %s2589_s2 = inlined_call_operand.vmem [shape: f32[2,1,8], index: 2, kind: input, shape index: {}]   ;;  %s2590_s3 = inlined_call_operand.hbm [shape: f32[32,32], index: 3, kind: input, shape index: {}]   ;;  %s2591_s4 = inlined_call_operand.vmem [shape: f32[1,32], index: 4, kind: input, shape index: {}]   ;;  %s2592_s5 = inlined_call_operand.hbm [shape: f32[32,64], index: 5, kind: input, shape index: {}]   ;;  %s2593_s6 = inlined_call_operand.vmem [shape: f32[1,64], index: 6, kind: input, shape index: {}]   ;;  %s2594_s7 = inlined_call_operand.hbm [shape: f32[32,32], index: 7, kind: input, shape index: {}]   ;;  %s2595_s8 = inlined_call_operand.vmem [shape: f32[1,32], index: 8, kind: input, shape index: {}]   ;;  %s2596_s9 = inlined_call_operand.hbm [shape: f32[2,8,32], index: 9, kind: output, shape index: {}]  }
   0x1   :  { %2604 = sst [smem:[#allocation21_spill]] %s2589_s2 }
   0x2   :  { %2605 = sst [smem:[#allocation22_spill]] %s2590_s3 }
   0x3   :  { %2606 = sst [smem:[#allocation23_spill]] %s2592_s5 }
   0x4   :  { %2607 = sst [smem:[#allocation24_spill]] %s2594_s7 }
   0x5   :  { %2608 = sst [smem:[#allocation25_spill]] %s2595_s8 }
   0x6   :  { %2609 = sst [smem:[#allocation26_spill]] %s2596_s9 }
   0x7   :  { %14 = vsyncpa [#allocation5], 0 }
   0x8   :  { %16 = vsyncpa [#allocation5 + $0x1], 0 }
   0x9   :  { %17 = vsyncpa [#allocation8], 0 }
   0xa   :  { %19 = vsyncpa [#allocation8 + $0x1], 0 }
   0xb   :  { %20 = vsyncpa [#allocation11], 0 }
   0xc   :  { %21 = vsyncpa [#allocation6], 0 }
   0xd   :  { %23 = vsyncpa [#allocation6 + $0x1], 0  ;;  %s2173_s30 = smov 0   ;;  %s2175_s10 = smov 0  }
   0xe   :  { %s2177_s11 = smov 0   ;;  %s2179_s12 = smov 0  }
   0xf   :  { %s2181_s13 = smov 0   ;;  %s2183_s14 = smov 0  }
  0x10 LB: > { %2610 = sst [smem:[#allocation19_spill]] %s2079_s30  ;;  %s2204_s15 = sadd.s32 4294967295, %s2099_s14   ;;  %s2099_s14 = sphi %s2183_s14, %s29_s14   ;;  %s2095_s13 = sphi %s2181_s13, %s2641_s13   ;;  %s2091_s12 = sphi %s2179_s12, %s2640_s12   ;;  %s2087_s11 = sphi %s2177_s11, %s2639_s11   ;;  %s2083_s10 = sphi %s2175_s10, %s2638_s10   ;;  %s2079_s30 = sphi %s2173_s30, %s2637_s30  }
  0x11   : > { %s1570_s16 = sadd.s32 4294967294, %s2099_s14   ;;  %p63_p0 = scmp.ne.s32.totalorder %s2083_s10, %s2079_s30 }
  0x12   : > { %p2598_p1 = scmp.eq.s32.totalorder %s2204_s15, 0  ;;  %p273_p3 = scmp.eq.s32.totalorder %s1570_s16, 1 }
  0x13   : > { %p1571_p5 = scmp.ge.s32.totalorder %s2099_s14, 1  ;;  %p280_p7 = scmp.lt.s32.totalorder %s2099_s14, 3 }
  0x14   : > { %p2213_p4 = por %p2598_p1, %p63_p0  ;;  %p2218_p6 = por %p273_p3, %p63_p0 }
  0x15   : > { %p2223_p8 = pnand %p1571_p5, %p280_p7  ;;  %s2101_s20 = smov [#allocation9]  }
  0x16   : > { %s2611_s17 = scalar_select %p2213_p4, 1, 0 }
  0x17   : > { %s2612_s18 = scalar_select %p2218_p6, 1, 0 }
  0x18   : > { %s2614_s19 = scalar_select %p2223_p8, 1, 0 }
  0x19   : > { %2613 = sst [smem:[#allocation20_spill]] %s2612_s18  ;;  %s292_s21 = sshll.u32 %s2101_s20, 4  ;;  %s2227_s21 = int_to_ptr.vmem [resolvable:$true] %s292_s21 }
  0x1a   : > { %p1749_p9 = pneg %p2223_p8  ;;  %s2102_s23 = smov [#allocation10]  }
  0x1b   : > { %s308_s24 = sshll.u32 %s2102_s23, 4  ;;  %s2103_s25 = smov [#allocation12]   ;;  %s2238_s24 = int_to_ptr.vmem [resolvable:$true] %s308_s24 }
  0x1c   : > { %p2234_p11 = pnand %p1749_p9, %p2598_p1  ;;  %s2240_s26 = sshll.u32 %s2103_s25, 4  ;;  %s325_s26 = int_to_ptr.vmem [resolvable:$true] %s2240_s26 }
  0x1d   : > { %s2616_s3 = sld [smem:[#allocation22_spill]] }
  0x1e   : > { %p2250_p13 = pneg %p2234_p11 }
  0x23   : > { %s1861_s29 = scalar_lea.hbm %s2616_s3, 512 }
  0x24   : > { %p1862_p12 = scmp.ne.s32.totalorder %s2616_s3, %s1861_s29  ;;  %p1868_p5 = scmp.lt.u32.totalorder %s1861_s29, %s2616_s3 }
  0x26   : > { %p1864_p0 = pnand %p2250_p13, %p1862_p12 }
  0x28   : > { %p1865_p3 = pneg %p1864_p0 }
  0x2a   : > { %p1870_p7 = pnand %p1868_p5, %p1865_p3 }
  0x2c   : > { %1873 = shalt.err (!%p1870_p7)
}
  0x2d   : > { %s1874_s27 = scalar_lea.vmem %s2227_s21, 512  ;;  %p1882_p2 = scmp.lt.s32.totalorder %s2227_s21, %s2227_s21 }
  0x2e   : > { %p1875_p9 = scmp.ne.s32.totalorder %s2227_s21, %s1874_s27  ;;  %p1883_p6 = scmp.lt.s32.totalorder %s1874_s27, %s1874_s27 }
  0x30   : > { %p1877_p10 = pnand %p1875_p9, %p2250_p13  ;;  %p1884_p12 = por %p1883_p6, %p1882_p2 }
  0x32   : > { %p1878_p1 = pneg %p1877_p10 }
  0x34   : > { %p1885_p0 = pnand %p1884_p12, %p1878_p1 }
  0x36   : > { %1888 = shalt.err (!%p1885_p0)
}
  0x37   : > { %s2104_s28 = smov 128   ;;  %s2105_s29 = smov 8  }
  0x38   : > { %1752 = dma.hbm_to_vmem [thread:$0]  (!%p2234_p11), %s2616_s3, 512, %s2227_s21, [#allocation8], %s2104_s28, %s2104_s28, %s2105_s29  }
  0x39   : > { %s2618_s5 = sld [smem:[#allocation23_spill]] }
  0x3f   : > { %s1889_s27 = scalar_lea.hbm %s2618_s5, 512 }
  0x40   : > { %p1890_p1 = scmp.ne.s32.totalorder %s2618_s5, %s1889_s27  ;;  %p1896_p10 = scmp.lt.u32.totalorder %s1889_s27, %s2618_s5 }
  0x42   : > { %p1892_p2 = pnand %p1890_p1, %p2250_p13 }
  0x44   : > { %p1893_p6 = pneg %p1892_p2 }
  0x46   : > { %p1898_p3 = pnand %p1896_p10, %p1893_p6 }
  0x48   : > { %1901 = shalt.err (!%p1898_p3)
}
  0x49   : > { %s1902_s21 = scalar_lea.vmem %s2238_s24, 512  ;;  %p1910_p12 = scmp.lt.s32.totalorder %s2238_s24, %s2238_s24 }
  0x4a   : > { %p1903_p5 = scmp.ne.s32.totalorder %s2238_s24, %s1902_s21  ;;  %p1911_p0 = scmp.lt.s32.totalorder %s1902_s21, %s1902_s21 }
  0x4c   : > { %p1905_p7 = pnand %p1903_p5, %p2250_p13  ;;  %p1912_p1 = por %p1911_p0, %p1910_p12 }
  0x4e   : > { %p1906_p9 = pneg %p1905_p7 }
  0x50   : > { %p1913_p2 = pnand %p1912_p1, %p1906_p9 }
  0x52   : > { %1916 = shalt.err (!%p1913_p2)
}
  0x53   : > { %1755 = dma.hbm_to_vmem [thread:$0]  (!%p2234_p11), %s2618_s5, 512, %s2238_s24, [#allocation11], %s2104_s28, %s2104_s28, %s2105_s29  }
  0x54   : > { %s2619_s7 = sld [smem:[#allocation24_spill]] }
  0x5a   : > { %s1917_s16 = scalar_lea.hbm %s2619_s7, 512 }
  0x5b   : > { %p1918_p6 = scmp.ne.s32.totalorder %s2619_s7, %s1917_s16  ;;  %p1924_p5 = scmp.lt.u32.totalorder %s1917_s16, %s2619_s7 }
  0x5d   : > { %p1920_p10 = pnand %p1918_p6, %p2250_p13 }
  0x5f   : > { %p1921_p3 = pneg %p1920_p10 }
  0x61   : > { %p1926_p7 = pnand %p1924_p5, %p1921_p3 }
  0x63   : > { %1929 = shalt.err (!%p1926_p7)
}
  0x64   : > { %s1930_s21 = scalar_lea.vmem %s325_s26, 512  ;;  %p1938_p1 = scmp.lt.s32.totalorder %s325_s26, %s325_s26 }
  0x65   : > { %p1931_p9 = scmp.ne.s32.totalorder %s325_s26, %s1930_s21  ;;  %p1939_p2 = scmp.lt.s32.totalorder %s1930_s21, %s1930_s21 }
  0x67   : > { %p1933_p12 = pnand %p1931_p9, %p2250_p13  ;;  %p1940_p4 = por %p1939_p2, %p1938_p1 }
  0x69   : > { %p1934_p0 = pneg %p1933_p12 }
  0x6b   : > { %p1941_p8 = pnand %p1940_p4, %p1934_p0 }
  0x6d   : > { %1944 = shalt.err (!%p1941_p8)
}
  0x6e   : > { %1758 = dma.hbm_to_vmem [thread:$0]  (!%p2234_p11), %s2619_s7, 512, %s325_s26, [#allocation11], %s2104_s28, %s2104_s28, %s2105_s29  }
  0x6f   : > { %s50_s18 = sadd.s32 1, %s2087_s11  ;;  %s41_s22 = sadd.s32 1, %s2095_s13 }
  0x70   : > { %p57_p4 = scmp.ne.s32.totalorder %s2087_s11, %s2083_s10  ;;  %p43_p8 = scmp.ge.s32.totalorder %s41_s22, 2 }
  0x71   : > { %p58_p13 = scmp.eq.s32.totalorder %s2099_s14, 0  ;;  %p2620_p6 = scmp.eq.s32.totalorder %s2204_s15, 1 }
  0x72   : > { %p1773_p3 = scmp.lt.s32.totalorder %s2099_s14, 2  ;;  %s2643_s22 = smov (%p43_p8, %s41_s22), 0 }
  0x73   : > { %p2329_p10 = por %p2620_p6, %p57_p4  ;;  %p59_p5 = por %p58_p13, %p57_p4 }
  0x74   : > { %s341_s9 = sand.u32 1, %s2087_s11   ;;  %s45_s30 = ssub.s32 %s2095_s13, %s2643_s22 }
  0x75   : > { %s2621_s8 = scalar_select %p2329_p10, 1, 0 }
  0x76   : > { %p48_p11 = scmp.eq.s32.totalorder %s45_s30, 0  ;;  %s2339_s26 = sshll.u32 %s341_s9, 3 }
  0x77   : > { %s1577_s28 = sshll.u32 %s2095_s13, 7  ;;  %s345_s25 = scalar_lea.vmem [#allocation4], %s2339_s26 }
  0x78   : > { %s2343_s29 = scalar_select %p48_p11, %s2087_s11, %s50_s18  }
  0x79   : > { %s2348_s23 = scalar_lea.hbm %s2587_s0, %s1577_s28  ;;  %s353_s27 = sshll.u32 %s345_s25, 4  ;;  %s2351_s27 = int_to_ptr.vmem [resolvable:$true] %s353_s27 }
  0x7a   : > { %p2355_p7 = pnand %p1773_p3, %p59_p5  ;;  %s2362_s18 = scalar_lea.hbm %s2588_s1, %s1577_s28 }
  0x7b   : > { %s360_s30 = sand.u32 1, %s2099_s14   ;;  %s342_s16 = scalar_lea.sflag [#allocation5], %s341_s9 }
  0x7c   : > { %s1945_s20 = scalar_lea.hbm %s2348_s23, 128  ;;  %p1947_p12 = pneg %p2355_p7 }
  0x7d   : > { %p1946_p9 = scmp.ne.s32.totalorder %s2348_s23, %s1945_s20  ;;  %s1950_s5 = scalar_lea.hbm %s2587_s0, 256 }
  0x7e   : > { %p1951_p2 = scmp.lt.u32.totalorder %s2348_s23, %s2587_s0  ;;  %p1952_p4 = scmp.lt.u32.totalorder %s1950_s5, %s1945_s20 }
  0x7f   : > { %p1948_p0 = pnand %p1947_p12, %p1946_p9  ;;  %p1954_p13 = scmp.lt.u32.totalorder %s1945_s20, %s2348_s23 }
  0x80   : > { %p1953_p8 = por %p1952_p4, %p1951_p2 }
  0x81   : > { %p1949_p1 = pneg %p1948_p0 }
  0x82   : > { %p1955_p6 = por %p1954_p13, %p1953_p8 }
  0x84   : > { %p1956_p3 = pnand %p1955_p6, %p1949_p1 }
  0x86   : > { %1959 = shalt.err (!%p1956_p3)
}
  0x87   : > { %s1960_s9 = scalar_lea.vmem %s2351_s27, 128  ;;  %s2106_s3 = smov [#allocation4]  }
  0x88   : > { %p1961_p5 = scmp.ne.s32.totalorder %s2351_s27, %s1960_s9  ;;  %s1965_s28 = sshll.u32 %s2106_s3, 4  ;;  %s1966_s28 = int_to_ptr.vmem [resolvable:$false] %s1965_s28 }
  0x89   : > { %s1967_s7 = scalar_lea.vmem %s1966_s28, 256  ;;  %p1968_p0 = scmp.lt.s32.totalorder %s2351_s27, %s1966_s28 }
  0x8a   : > { %p1963_p11 = pnand %p1961_p5, %p1947_p12  ;;  %p1969_p2 = scmp.lt.s32.totalorder %s1967_s7, %s1960_s9 }
  0x8c   : > { %p1964_p9 = pneg %p1963_p11  ;;  %p1970_p4 = por %p1969_p2, %p1968_p0 }
  0x8e   : > { %p1971_p8 = pnand %p1970_p4, %p1964_p9 }
  0x90   : > { %1974 = shalt.err (!%p1971_p8)
}
  0x91   : > { %1762 = dma.hbm_to_vmem [thread:$0]  (!%p2355_p7), %s2348_s23, 128, %s2351_s27, %s342_s16  }
  0x92   : > { %s364_s5 = scalar_lea.vmem [#allocation7], %s2339_s26  ;;  %s361_s20 = scalar_lea.sflag [#allocation8], %s360_s30 }
  0x93   : > { %s371_s2 = sshll.u32 %s364_s5, 4  ;;  %s1975_s25 = scalar_lea.hbm %s2362_s18, 128  ;;  %s372_s2 = int_to_ptr.vmem [resolvable:$true] %s371_s2 }
  0x94   : > { %p1976_p1 = scmp.ne.s32.totalorder %s2362_s18, %s1975_s25  ;;  %s1980_s3 = scalar_lea.hbm %s2588_s1, 256 }
  0x95   : > { %p1981_p3 = scmp.lt.u32.totalorder %s2362_s18, %s2588_s1  ;;  %p1982_p5 = scmp.lt.u32.totalorder %s1980_s3, %s1975_s25 }
  0x96   : > { %p1978_p13 = pnand %p1976_p1, %p1947_p12  ;;  %p1984_p9 = scmp.lt.u32.totalorder %s1975_s25, %s2362_s18 }
  0x97   : > { %p1983_p11 = por %p1982_p5, %p1981_p3 }
  0x98   : > { %p1979_p6 = pneg %p1978_p13 }
  0x99   : > { %p1985_p0 = por %p1984_p9, %p1983_p11 }
  0x9b   : > { %p1986_p2 = pnand %p1985_p0, %p1979_p6 }
  0x9d   : > { %1989 = shalt.err (!%p1986_p2)
}
  0x9e   : > { %s1990_s26 = scalar_lea.vmem %s372_s2, 128  ;;  %s2107_s23 = smov [#allocation7]  }
  0x9f   : > { %p1991_p4 = scmp.ne.s32.totalorder %s372_s2, %s1990_s26  ;;  %s1995_s27 = sshll.u32 %s2107_s23, 4  ;;  %s1996_s27 = int_to_ptr.vmem [resolvable:$false] %s1995_s27 }
  0xa0   : > { %s1997_s30 = scalar_lea.vmem %s1996_s27, 256  ;;  %p1998_p13 = scmp.lt.s32.totalorder %s372_s2, %s1996_s27 }
  0xa1   : > { %p1993_p8 = pnand %p1991_p4, %p1947_p12  ;;  %p1999_p10 = scmp.lt.s32.totalorder %s1997_s30, %s1990_s26 }
  0xa3   : > { %p1994_p1 = pneg %p1993_p8  ;;  %p2000_p3 = por %p1999_p10, %p1998_p13 }
  0xa5   : > { %p2001_p5 = pnand %p2000_p3, %p1994_p1 }
  0xa7   : > { %2004 = shalt.err (!%p2001_p5)
}
  0xa8   : > { %1765 = dma.hbm_to_vmem [thread:$0]  (!%p2355_p7), %s2362_s18, 128, %s372_s2, %s361_s20  }
  0xa9   : > { %p2623_p6 = scmp.ne.s32.totalorder %s2614_s19, 0 }
  0xaa   : > { %s2415_s16 = sand.u32 (!%p2623_p6), 1, %s2083_s10   ;;  %p2624_p10 = scmp.ne.s32.totalorder (!%p2623_p6), %s2611_s17, 0 }
  0xab   : > { %386 = sbr.rel (%p2623_p6) target bundleno = 1484 (0x5cc), region = 56  ;;  %s2418_s5 = sshll.u32 (!%p2623_p6), %s2415_s16, 3 }
  0xac   : > { %s389_s25 = scalar_lea.sflag (!%p2623_p6), [#allocation5], %s2415_s16  ;;  %s392_s24 = scalar_lea.vmem (!%p2623_p6), [#allocation4], %s2418_s5 }
  0xb2   : > { %2058 = dma.done.wait (%p2624_p10), %s389_s25, 128  }
  0xb3   : > { %2060 = vsyncadd (%p2624_p10), %s389_s25, 4294967168  ;;  %s397_s19 = sand.u32 1, %s2204_s15   ;;  %s401_s18 = scalar_lea.vmem [#allocation7], %s2418_s5 }
  0xb4   : > { %s398_s21 = scalar_lea.sflag [#allocation8], %s397_s19 }
  0xb5   : > { %2062 = dma.done.wait (%p2624_p10), %s398_s21, 128  }
  0xb6   : > { %2064 = vsyncadd (%p2624_p10), %s398_s21, 4294967168  ;;  %p2625_p7 = scmp.eq.s32.totalorder %s2204_s15, 0 }
  0xb8   : > { %2066 = dma.done.wait (%p2625_p7), [#allocation8], 512   ;;  %p2626_p12 = pmov %p2625_p7 }
  0xb9   : > { %p2627_p11 = pmov %p2625_p7 }
  0xba   : > { %2068 = vsyncadd (%p2626_p12), [#allocation8], 4294966784 }
  0xbb   : > { %2070 = dma.done.wait (%p2627_p11), [#allocation11], 1024   ;;  %p2628_p9 = pmov %p2625_p7 }
  0xbc   : > { %v2108_v0 = vmov 0.0|0.0   ;;  %vm2109_vm0 = vmmov 0   ;;  %v2110_v1 = vmov 0.0   ;;  %v464_v2 = vld [vmem:[#allocation10] sm:$0xff]  ;;  %v465_v3 = vld [vmem:[#allocation10 + $0x8] sm:$0xff]  ;;  %v466_v4 = vld [vmem:[#allocation10 + $0x10] sm:$0xff]  ;;  %v718_v32 = vlaneseq }
  0xbd   : > { %2072 = vsyncadd (%p2628_p9), [#allocation11], 4294966272  ;;  %1713 = vmatprep.subr.bf16.mxu0 %v2108_v0  ;;  %1648 = vmatprep.mubr.msk.f32.mxu0 %vm2109_vm0, %v2110_v1  ;;  %v1714_v5 = vpack.c.bf16 %v465_v3, %v464_v2  ;;  %v467_v6 = vld [vmem:[#allocation10 + $0x18] sm:$0xff]  ;;  %v552_v7 = vld [vmem:[#allocation9] sm:$0xff]  ;;  %vm475_vm1 = vcmask 261120   ;;  %vm549_vm2 = vcmask 523264  }
  0xbe   : > { %1719 = vmatprep.subr.bf16.mxu1 %v2108_v0  ;;  %1659 = vmatprep.mubr.msk.f32.mxu1 %vm2109_vm0, %v2110_v1  ;;  %v553_v8 = vld [vmem:[#allocation9 + $0x8] sm:$0xff]  ;;  %v554_v9 = vld [vmem:[#allocation9 + $0x10] sm:$0xff]  ;;  %v555_v10 = vld [vmem:[#allocation9 + $0x18] sm:$0xff]  ;;  %v1717_v11 = vpack.c.bf16 %v467_v6, %v466_v4  ;;  %vm640_vm3 = vcmask 64512   ;;  %s2111_s9 = smov 112   ;;  %s2112_s3 = smov 120  }
  0xbf   : > { %1715 = vmatpush3.bf16.msra.mxu0 %v1714_v5  ;;  %v1720_v12 = vpack.c.bf16 %v553_v8, %v552_v7  ;;  %v1723_v13 = vpack.c.bf16 %v555_v10, %v554_v9  ;;  %v463_v14 = vld [vmem:[%s401_s18] sm:$0xff]  ;;  %v551_v15 = vld [vmem:[%s392_s24] sm:$0xff]  ;;  %s2113_s28 = smov 104   ;;  %s2114_s7 = smov 96   ;;  %v719_v34 = vshrl.u32 %v718_v32, 7  ;;  %v2115_v36 = vmov 0  }
  0xc0   : > { %1716 = vmatprep.subr.bf16.mxu0 %v2108_v0  ;;  %v1587_v16 = vld [vmem:[%s2593_s6] ss:$0 sm:$0xff]  ;;  %p456_p0 = scmp.lt.s32.totalorder %s2091_s12, 1  ;;  %s2629_s30 = sld [smem:[#allocation21_spill]]  ;;  %vm982_vm6 = vcmask 130112   ;;  %vm1154_vm7 = vcmask 195712  }
  0xc1   : > { %1721 = vmatpush3.bf16.msra.mxu1 %v1720_v12  ;;  %v1589_v22 = vld [vmem:[%s2591_s4] ss:$0 sm:$0xff]  ;;  %v720_v35 = vsub.s32 0, %v719_v34  ;;  %s2116_s24 = smov 80   ;;  %s2117_s19 = smov 72   ;;  %vm1326_vm8 = vcmask 261312  }
  0xc2   : > { %1722 = vmatprep.subr.bf16.mxu1 %v2108_v0  ;;  %s457_s26 = scalar_select %p456_p0, %s2091_s12, 1 }
  0xc3   : > { %1718 = vmatpush3.bf16.msra.mxu0 %v1717_v11  ;;  %s2118_s21 = smov 88   ;;  %s2119_s18 = smov 8  }
  0xc4   : > { %1672 = vmatprep.subr.mxu0 %v2110_v1  ;;  %s2120_s15 = smov 16   ;;  %s2121_s17 = smov 24  }
  0xc5   : > { %1724 = vmatpush3.bf16.msra.mxu1 %v1723_v13  ;;  %s2631_s27 = sld [smem:[#allocation26_spill]]  ;;  %p2632_p4 = scmp.ne.s32.totalorder %s2621_s8, 0 }
  0xc6   : > { %1649 = vmatmul.mubr.msk.f32.vlgmr.msra.gmra.mrb[0].mxu0 %vm475_vm1, %v463_v14  ;;  %1662 = vmatprep.subr.mxu1 %v2110_v1  ;;  %s458_s25 = scalar_lea.vmem %s2629_s30, %s457_s26 }
  0xc7   : > { %1674 = vmatprep.mubr.msk.f32.mxu0 %vm2109_vm0, %v2110_v1  ;;  %v638_v33 = vld [vmem:[%s458_s25] sm:$0x1]  ;;  %s1415_s25 = scalar_lea.sflag [#allocation6], %s2415_s16 }
  0xc8   : > { %1660 = vmatmul.mubr.msk.f32.vlgmr.msra.gmra.mrb[0].mxu1 %vm475_vm1, %v551_v15  ;;  %vm639_vm4 = vcmp.eq.f32.partialorder %v638_v33, 0.0 }
  0xc9   : > { %1664 = vmatprep.mubr.msk.f32.mxu1 %vm2109_vm0, %v2110_v1  ;;  %v717_v37 = vsel %vm639_vm4, 1, %v2115_v36 }
  0xca   : > { %v721_v38 = vrot.slane %v717_v37, %v720_v35 }
  0xcc   : > { %vm722_vm5 = vcmp.eq.s32.totalorder %v721_v38, 1 }
 0x199   : > { %v545_v17 = vpop.f32.mrb[0].mxu0 }
 0x19a   : > { %v546_v18 = vadd.f32 %v1587_v16, %v545_v17  ;;  %v1650_v19 = vpop.f32.mrb[1].mxu0 }
 0x19b   : > { %v633_v20 = vpop.f32.mrb[0].mxu1 }
 0x19c   : > { %550 = vst.msk [vmem:[#allocation2] sm:$0xff] %vm549_vm2, %v546_v18  ;;  %v1661_v21 = vpop.f32.mrb[1].mxu1  ;;  %v634_v24 = vadd.f32 %v1589_v22, %v633_v20 }
 0x1a3   : > { %v2466_v23 = vld [vmem:[#allocation2] sm:$0xff] }
 0x1a4   : > { %986 = vrot.lane.b32.xlu1 %v2466_v23, %s2111_s9  ;;  %814 = vrot.lane.b32.xlu0 %v2466_v23, %s2112_s3 }
 0x1a5   : > { %1663 = vmatpush3.xpose.msk.msra.mxu1 %vm640_vm3, %v2466_v23 }
 0x1a6   : > { %1667 = vmatprep.subr.mxu1 %v2110_v1 }
 0x1a8   : > { %1665 = vmatmul.mubr.msk.f32.vlgmr.msra.gmra.mrb[2].mxu1 %vm640_vm3, %v634_v24  ;;  %984 = vrot.lane.b32.xlu1 %v634_v24, %s2111_s9  ;;  %s2630_s9 = sld [smem:[#allocation25_spill]] }
 0x1a9   : > { %812 = vrot.lane.b32.xlu0 %v634_v24, %s2112_s3  ;;  %1669 = vmatprep.mubr.msk.f32.mxu1 %vm2109_vm0, %v2110_v1  ;;  %s1606_s3 = sshll.u32 %s2091_s12, 7  ;;  %s2122_s12 = smov [#allocation13]  }
 0x1aa   : > { %s2537_s30 = scalar_lea.hbm %s2631_s27, %s1606_s3 }
 0x1ac   : > { %1156 = vrot.lane.b32.xlu1 %v634_v24, %s2113_s28  ;;  %v1330_v24 = vld [vmem:[#allocation12 + $0x8] sm:$0xff] }
 0x1ad   : > { %1158 = vrot.lane.b32.xlu0 %v2466_v23, %s2113_s28  ;;  %s455_s28 = scalar_lea.vmem [#allocation13], %s2418_s5  ;;  %s2009_s5 = sshll.u32 %s2122_s12, 4  ;;  %s2010_s5 = int_to_ptr.vmem [resolvable:$false] %s2009_s5 }
 0x1b0   : > { %733 = vrot.lane.b32.xlu1 %v2466_v23, %s2114_s7  ;;  %s1429_s7 = sshll.u32 %s455_s28, 4  ;;  %s2539_s7 = int_to_ptr.vmem [resolvable:$true] %s1429_s7 }
 0x1b1   : > { %p2012_p13 = scmp.lt.s32.totalorder %s2539_s7, %s2010_s5 }
 0x216   : > { %v987_v25 = vpop.permute.xlu1 %986  ;;  %v815_v26 = vpop.permute.xlu0 %814 }
 0x217   : > { %1673 = vmatpush3.xpose.msk.msra.mxu0 %vm640_vm3, %v815_v26  ;;  %v1331_v26 = vld [vmem:[#allocation12 + $0x10] sm:$0xff] }
 0x218   : > { %1682 = vmatprep.subr.mxu0 %v2110_v1 }
 0x21a   : > { %v985_v27 = vpop.permute.xlu1 %984 }
 0x21b   : > { %v813_v28 = vpop.permute.xlu0 %812 }
 0x21c   : > { %1675 = vmatmul.mubr.msk.f32.vlgmr.msra.gmra.mrb[2].mxu0 %vm640_vm3, %v813_v28 }
 0x21d   : > { %1683 = vmatpush3.xpose.msk.msra.mxu0 %vm640_vm3, %v987_v25  ;;  %1684 = vmatprep.mubr.msk.f32.mxu0 %vm2109_vm0, %v2110_v1 }
 0x21e   : > { %v1157_v29 = vpop.permute.xlu1 %1156  ;;  %1692 = vmatprep.subr.mxu0 %v2110_v1 }
 0x21f   : > { %v1159_v30 = vpop.permute.xlu0 %1158 }
 0x220   : > { %1685 = vmatmul.mubr.msk.f32.vlgmr.msra.gmra.mrb[4].mxu0 %vm640_vm3, %v985_v27  ;;  %v1332_v27 = vld [vmem:[#allocation12 + $0x18] sm:$0xff] }
 0x221   : > { %1693 = vmatpush3.xpose.msk.msra.mxu0 %vm640_vm3, %v1159_v30  ;;  %1694 = vmatprep.mubr.msk.f32.mxu0 %vm2109_vm0, %v2110_v1  ;;  %v1729_v30 = vpack.c.bf16 %v1332_v27, %v1331_v26 }
 0x222   : > { %v734_v31 = vpop.permute.xlu1 %733  ;;  %1725 = vmatprep.subr.bf16.mxu0 %v2108_v0 }
 0x223   : > { %1668 = vmatpush3.msra.mxu1 %v734_v31 }
 0x224   : > { %1695 = vmatmul.mubr.msk.f32.vlgmr.msra.gmra.mrb[6].mxu0 %vm640_vm3, %v1157_v29  ;;  %1677 = vmatprep.subr.mxu1 %v2110_v1 }
 0x225   : > { %1710 = vmatprep.mubr.msk.f32.mxu0 %vm2109_vm0, %v2110_v1 }
 0x27b   : > { %v713_v39 = vpop.f32.mrb[2].mxu1 }
 0x27c   : > { %v723_v40 = vsel %vm722_vm5, -1e+20, %v713_v39  ;;  %v1666_v41 = vpop.f32.mrb[3].mxu1 }
 0x27d   : > { %v724_v42 = vsel %vm640_vm3, %v723_v40, -inf }
 0x27e   : > { %725 = vmax.xlane.f32.xlu0 %v724_v42 }
 0x2ef   : > { %v886_v43 = vpop.f32.mrb[2].mxu0 }
 0x2f0   : > { %v890_v44 = vsel %vm722_vm5, -1e+20, %v886_v43  ;;  %v1676_v45 = vpop.f32.mrb[3].mxu0 }
 0x2f1   : > { %v891_v46 = vsel %vm640_vm3, %v890_v44, -inf }
 0x2f2   : > { %892 = vmax.xlane.f32.xlu1 %v891_v46 }
 0x2f3   : > { %v1058_v47 = vpop.f32.mrb[4].mxu0 }
 0x2f4   : > { %v1062_v48 = vsel %vm722_vm5, -1e+20, %v1058_v47  ;;  %v1686_v49 = vpop.f32.mrb[5].mxu0 }
 0x2f5   : > { %v1063_v50 = vsel %vm640_vm3, %v1062_v48, -inf }
 0x2f6   : > { %1064 = vmax.xlane.f32.xlu0 %v1063_v50 }
 0x2f7   : > { %v1230_v51 = vpop.f32.mrb[6].mxu0 }
 0x2f8   : > { %v1234_v52 = vsel %vm722_vm5, -1e+20, %v1230_v51  ;;  %v1696_v53 = vpop.f32.mrb[7].mxu0 }
 0x2f9   : > { %v1235_v54 = vsel %vm640_vm3, %v1234_v52, -inf }
 0x2fa   : > { %1236 = vmax.xlane.f32.xlu0 %v1235_v54 }
 0x303   : > { %1072 = vrot.lane.b32.xlu1 %v2466_v23, %s2116_s24  ;;  %s2005_s24 = scalar_lea.vmem %s2539_s7, 128 }
 0x304   : > { %p2006_p2 = scmp.ne.s32.totalorder %s2539_s7, %s2005_s24 }
 0x306   : > { %p2007_p8 = pnand %p2006_p2, %p2632_p4 }
 0x307   : > { %1244 = vrot.lane.b32.xlu1 %v2466_v23, %s2117_s19  ;;  %s2011_s19 = scalar_lea.vmem %s2010_s5, 256 }
 0x308   : > { %p2008_p1 = pneg %p2007_p8  ;;  %p2013_p3 = scmp.lt.s32.totalorder %s2011_s19, %s2005_s24 }
 0x30a   : > { %p2014_p5 = por %p2013_p3, %p2012_p13 }
 0x30b   : > { %v726_v55 = vpop.xlane.xlu0 %725 }
 0x30c   : > { %v727_v56 = vsub.f32 %v723_v40, %v726_v55  ;;  %p2015_p6 = pnand %p2014_p5, %p2008_p1 }
 0x30e   : > { %v728_v57 = vmul.f32 1.442695, %v727_v56 }
 0x310   : > { %1845 = vpow2.f32 %v728_v57  ;;  %900 = vrot.lane.b32.xlu0 %v2466_v23, %s2118_s21  ;;  %v1329_v23 = vld [vmem:[#allocation12] sm:$0xff] }
 0x311   : > { %v1726_v25 = vpack.c.bf16 %v1330_v24, %v1329_v23 }
 0x313   : > { %1727 = vmatpush3.bf16.msra.mxu0 %v1726_v25 }
 0x314   : > { %1728 = vmatprep.subr.bf16.mxu0 %v2108_v0 }
 0x317   : > { %1730 = vmatpush3.bf16.msra.mxu0 %v1729_v30 }
 0x31a   : > { %v1846_v58 = vpop.eup %1845 }
 0x31b   : > { %1670 = vmatmul.mubr.msk.f32.vlgmr.msra.gmra.mrb[4].mxu1 %vm640_vm3, %v1846_v58  ;;  %v730_v15 = vsel %vm640_vm3, %v1846_v58, 0.0 }
 0x31c   : > { %1679 = vmatprep.mubr.msk.f32.mxu1 %vm2109_vm0, %v2110_v1 }
 0x37f   : > { %v893_v59 = vpop.xlane.xlu1 %892 }
 0x380   : > { %v894_v60 = vsub.f32 %v890_v44, %v893_v59  ;;  %v1603_v44 = vld [vmem:[%s2630_s9] ss:$0 sm:$0xff] }
 0x382   : > { %v895_v61 = vmul.f32 1.442695, %v894_v60 }
 0x383   : > { %v1065_v62 = vpop.xlane.xlu0 %1064  ;;  %v1073_v7 = vpop.permute.xlu1 %1072 }
 0x384   : > { %1847 = vpow2.f32 %v895_v61  ;;  %v1066_v63 = vsub.f32 %v1062_v48, %v1065_v62 }
 0x386   : > { %v1067_v2 = vmul.f32 1.442695, %v1066_v63 }
 0x387   : > { %v1237_v3 = vpop.xlane.xlu0 %1236  ;;  %v1245_v11 = vpop.permute.xlu1 %1244 }
 0x388   : > { %1849 = vpow2.f32 %v1067_v2  ;;  %v1238_v4 = vsub.f32 %v1234_v52, %v1237_v3 }
 0x38a   : > { %v1239_v5 = vmul.f32 1.442695, %v1238_v4 }
 0x38b   : > { %v901_v6 = vpop.permute.xlu0 %900 }
 0x38c   : > { %1851 = vpow2.f32 %v1239_v5  ;;  %1678 = vmatpush3.msra.mxu1 %v901_v6 }
 0x38d   : > { %1687 = vmatprep.subr.mxu1 %v2110_v1 }
 0x38e   : > { %v1848_v8 = vpop.eup %1847 }
 0x38f   : > { %1680 = vmatmul.mubr.msk.f32.vlgmr.msra.gmra.mrb[6].mxu1 %vm640_vm3, %v1848_v8  ;;  %v897_v9 = vsel %vm640_vm3, %v1848_v8, 0.0 }
 0x390   : > { %1688 = vmatpush3.msra.mxu1 %v1073_v7  ;;  %898 = vadd.xlane.f32.xlu0 %v897_v9 }
 0x391   : > { %1689 = vmatprep.mubr.msk.f32.mxu1 %vm2109_vm0, %v2110_v1  ;;  %1697 = vmatprep.subr.mxu1 %v2110_v1 }
 0x392   : > { %v1850_v10 = vpop.eup %1849 }
 0x393   : > { %1690 = vmatmul.mubr.msk.f32.vlgmr.msra.gmra.mrb[8].mxu1 %vm640_vm3, %v1850_v10  ;;  %v1069_v12 = vsel %vm640_vm3, %v1850_v10, 0.0 }
 0x394   : > { %1698 = vmatpush3.msra.mxu1 %v1245_v11  ;;  %1070 = vadd.xlane.f32.xlu1 %v1069_v12 }
 0x395   : > { %1699 = vmatprep.mubr.msk.f32.mxu1 %vm2109_vm0, %v2110_v1 }
 0x396   : > { %v1852_v13 = vpop.eup %1851 }
 0x397   : > { %1700 = vmatmul.mubr.msk.f32.vlgmr.msra.gmra.mrb[10].mxu1 %vm640_vm3, %v1852_v13  ;;  %v1241_v14 = vsel %vm640_vm3, %v1852_v13, 0.0 }
 0x398   : > { %1242 = vadd.xlane.f32.xlu0 %v1241_v14 }
 0x39c   : > { %731 = vadd.xlane.f32.xlu0 %v730_v15 }
 0x3ee   : > { %v805_v16 = vpop.f32.mrb[4].mxu1 }
 0x3ef   : > { %v1671_v17 = vpop.f32.mrb[5].mxu1 }
 0x41d   : > { %v899_v18 = vpop.xlane.xlu0 %898 }
 0x421   : > { %v1071_v1 = vpop.xlane.xlu1 %1070 }
 0x425   : > { %v1243_v19 = vpop.xlane.xlu0 %1242 }
 0x429   : > { %v732_v20 = vpop.xlane.xlu0 %731 }
 0x42a   : > { %1853 = vrcp.f32 %v732_v20 }
 0x42b   : > { %1855 = vrcp.f32 %v899_v18 }
 0x42c   : > { %1857 = vrcp.f32 %v1071_v1 }
 0x42d   : > { %1859 = vrcp.f32 %v1243_v19 }
 0x434   : > { %v1854_v21 = vpop.eup %1853 }
 0x435   : > { %v810_v22 = vmul.f32 %v1854_v21, %v805_v16  ;;  %v1856_v28 = vpop.eup %1855 }
 0x436   : > { %v1858_v33 = vpop.eup %1857 }
 0x437   : > { %811 = vst.msk [vmem:[#allocation3] sm:$0xff] %vm640_vm3, %v810_v22  ;;  %v1860_v37 = vpop.eup %1859 }
 0x462   : > { %v972_v29 = vpop.f32.mrb[6].mxu1 }
 0x463   : > { %v977_v31 = vmul.f32 %v1856_v28, %v972_v29  ;;  %v1681_v32 = vpop.f32.mrb[7].mxu1 }
 0x465   : > { %979 = vrot.lane.b32.xlu1 %v977_v31, %s2119_s18 }
 0x466   : > { %v1144_v34 = vpop.f32.mrb[8].mxu1 }
 0x467   : > { %v1149_v35 = vmul.f32 %v1858_v33, %v1144_v34  ;;  %v1691_v36 = vpop.f32.mrb[9].mxu1 }
 0x469   : > { %1151 = vrot.lane.b32.xlu0 %v1149_v35, %s2120_s15 }
 0x46a   : > { %v1316_v38 = vpop.f32.mrb[10].mxu1 }
 0x46b   : > { %v1321_v39 = vmul.f32 %v1860_v37, %v1316_v38  ;;  %v1701_v40 = vpop.f32.mrb[11].mxu1 }
 0x46d   : > { %1323 = vrot.lane.b32.xlu1 %v1321_v39, %s2121_s17 }
 0x4d7   : > { %v980_v41 = vpop.permute.xlu1 %979 }
 0x4d8   : > { %983 = vst.msk [vmem:[#allocation3] sm:$0xff] %vm982_vm6, %v980_v41 }
 0x4db   : > { %v1152_v0 = vpop.permute.xlu0 %1151 }
 0x4dc   : > { %1155 = vst.msk [vmem:[#allocation3] sm:$0xff] %vm1154_vm7, %v1152_v0 }
 0x4df   : > { %v1324_v42 = vpop.permute.xlu1 %1323 }
 0x4e0   : > { %1327 = vst.msk [vmem:[#allocation3] sm:$0xff] %vm1326_vm8, %v1324_v42 }
 0x4e7   : > { %v1328_v43 = vld [vmem:[#allocation3] sm:$0xff] }
 0x4e8   : > { %1711 = vmatmul.mubr.msk.f32.vlgmr.msra.gmra.mrb[8].mxu0 %vm475_vm1, %v1328_v43 }
 0x5bb   : > { %v1409_v45 = vpop.f32.mrb[8].mxu0 }
 0x5bc   : > { %v1410_v46 = vadd.f32 %v1603_v44, %v1409_v45  ;;  %v1712_v47 = vpop.f32.mrb[9].mxu0 }
 0x5be   : > { %1413 = vst.msk [vmem:[%s455_s28] sm:$0xff] %vm475_vm1, %v1410_v46 }
 0x5bf   : > { %2018 = shalt.err (!%p2015_p6)
}
 0x5c0   : > { %s2019_s16 = scalar_lea.hbm %s2537_s30, 128  ;;  %s2023_s15 = scalar_lea.hbm %s2631_s27, 256 }
 0x5c1   : > { %p2020_p10 = scmp.ne.s32.totalorder %s2537_s30, %s2019_s16  ;;  %p2024_p11 = scmp.lt.u32.totalorder %s2537_s30, %s2631_s27 }
 0x5c2   : > { %p2025_p9 = scmp.lt.u32.totalorder %s2023_s15, %s2019_s16  ;;  %p2027_p2 = scmp.lt.u32.totalorder %s2019_s16, %s2537_s30 }
 0x5c3   : > { %p2021_p7 = pnand %p2020_p10, %p2632_p4 }
 0x5c4   : > { %p2026_p0 = por %p2025_p9, %p2024_p11 }
 0x5c5   : > { %p2022_p12 = pneg %p2021_p7 }
 0x5c6   : > { %p2028_p8 = por %p2027_p2, %p2026_p0 }
 0x5c8   : > { %p2029_p1 = pnand %p2028_p8, %p2022_p12 }
 0x5ca   : > { %2032 = shalt.err (!%p2029_p1)
}
 0x5cb   : > { %1747 = dma.vmem_to_hbm [thread:$0]  (%p2632_p4), %s2539_s7, 128, %s2537_s30, %s1415_s25  }
 0x5cc PF: > { %s2633_s20 = sld [smem:[#allocation19_spill]]  ;;  %s2634_s9 = sld [smem:[#allocation20_spill]] }
 0x5cd   : > { %p2636_p3 = scmp.ge.s32.totalorder %s2099_s14, 2 }
 0x5d2   : > { %s1441_s3 = sand.u32 1, %s2633_s20   ;;  %p2635_p13 = scmp.ne.s32.totalorder %s2634_s9, 0 }
 0x5d3   : > { %s1442_s28 = scalar_lea.sflag [#allocation6], %s1441_s3 }
 0x5d4   : > { %p1767_p5 = pnand %p2636_p3, %p2635_p13 }
 0x5d6   : > { %2074 = dma.done.wait (!%p1767_p5), %s1442_s28, 128  }
 0x5d7   : > { %2076 = vsyncadd (!%p1767_p5), %s1442_s28, 4294967168  ;;  %s29_s14 = sadd.s32 1, %s2099_s14   ;;  %s2637_s30 = smov %s2083_s10 }
 0x5d8   : > { %p26_p6 = scmp.ge.s32.totalorder %s29_s14, 4   ;;  %s2638_s10 = smov %s2087_s11 }
 0x5d9   : > { %s2639_s11 = smov %s2343_s29  ;;  %s2640_s12 = smov %s2095_s13 }
 0x5da   : > { %s2641_s13 = smov %s2643_s22  ;;  %28 = sbr.rel (!%p26_p6) target bundleno = 16 (0x10), region = 133 }
 0x5e1   :  { %1447 = vsyncpa [#allocation5], 1 }
 0x5e2   :  { %1449 = vsyncpa [#allocation5 + $0x1], 1 }
 0x5e3   :  { %1450 = vsyncpa [#allocation8], 1 }
 0x5e4   :  { %1452 = vsyncpa [#allocation8 + $0x1], 1 }
 0x5e5   :  { %1453 = vsyncpa [#allocation11], 1 }
 0x5e6   :  { %1454 = vsyncpa [#allocation6], 1 }
 0x5e7   :  { %1456 = vsyncpa [#allocation6 + $0x1], 1 }

</bundles_post_ra>
